<compile_context>
chip_gen: v7x
topology: tpu7x:2x2x1
jax: 0.10.0
libtpu: 0.0.40
codegen_flags: <defaults>
</compile_context>

<pallas_src>
import functools

import jax
import jax.numpy as jnp
from jax import lax
from jax.experimental import pallas as pl
from jax.experimental.pallas import tpu as pltpu


# --------------------------------------------------------------------------
# VMEM budget / tile selection
# --------------------------------------------------------------------------
def _vmem_budget_bytes():
    """Generation-aware scoped-VMEM budget (leave headroom for the compiler)."""
    cap = None
    try:
        info = pltpu.get_tpu_info()
        cap = int(getattr(info, "vmem_capacity_bytes", 0)) or None
    except Exception:
        cap = None
    if cap is None:
        cap = 64 << 20  # conservative: v7x per-TC physical VMEM
    return max(32 << 20, min(cap - (16 << 20), 96 << 20))


def _choose_tiles(n, c, hw, itemsize, target_bytes):
    """Pick (TN, T) for ~target_bytes x-blocks.

    Grow the lane tile T first (it sets the contiguous HBM run length of every
    DMA descriptor and makes stores lane-dense), then spend the leftover budget
    on TN.  T is either a multiple of 128 or the full HW extent (both legal).
    """
    max_lane = max(512, target_bytes // max(1, c * itemsize))
    if hw <= max_lane:
        t = hw                                    # full extent: always legal
    else:
        t = max(128, (max_lane // 128) * 128)
    per_n = max(1, c * t * itemsize)
    tn = int(max(1, min(n, target_bytes // per_n)))
    return tn, t


# --------------------------------------------------------------------------
# Pass 1: per-(N-tile, channel) partial sum / sum-of-squares.
# --------------------------------------------------------------------------
def _stats_kernel(x_ref, psum_ref, psumsq_ref,          # input / outputs
                  sum_sc, sumsq_sc,                      # (C, T) f32 scratch
                  *, tn, t, n_total, hw, mask_n, mask_hw):
    nb = pl.program_id(0)
    jb = pl.program_id(1)

    @pl.when(jb == 0)
    def _init():
        sum_sc[...] = jnp.zeros_like(sum_sc)
        sumsq_sc[...] = jnp.zeros_like(sumsq_sc)

    x = x_ref[...].astype(jnp.float32)                   # (TN, C, T)

    def _accum(xv):
        # Elementwise accumulation: VPU adds only; the XLU lane reduce is
        # deferred to the finalize below.
        sum_sc[...] += jnp.sum(xv, axis=0)
        sumsq_sc[...] += jnp.sum(xv * xv, axis=0)

    if not (mask_n or mask_hw):
        _accum(x)                                        # common fast path
    else:
        edge_conds = []
        if mask_n:
            edge_conds.append(nb == pl.num_programs(0) - 1)
        if mask_hw:
            edge_conds.append(jb == pl.num_programs(1) - 1)
        is_edge = edge_conds[0]
        for cnd in edge_conds[1:]:
            is_edge = jnp.logical_or(is_edge, cnd)

        @pl.when(is_edge)
        def _edge():
            valid = None
            if mask_n:
                row = nb * tn + lax.broadcasted_iota(jnp.int32, x.shape, 0)
                valid = row < n_total
            if mask_hw:
                col = jb * t + lax.broadcasted_iota(jnp.int32, x.shape, 2)
                vcol = col < hw
                valid = vcol if valid is None else jnp.logical_and(valid, vcol)
            _accum(jnp.where(valid, x, 0.0))

        @pl.when(jnp.logical_not(is_edge))
        def _interior():
            _accum(x)

    @pl.when(jb == pl.num_programs(1) - 1)
    def _finalize():
        # Single cross-lane reduction per N-tile, written to this tile's
        # partial-sum output block (shape (1, C, 1)).
        psum_ref[...] = jnp.sum(sum_sc[...], axis=-1, keepdims=True)[None]
        psumsq_ref[...] = jnp.sum(sumsq_sc[...], axis=-1, keepdims=True)[None]


# --------------------------------------------------------------------------
# Pass 2: normalize with precomputed per-channel mean / inv_std.
# --------------------------------------------------------------------------
def _normalize_kernel(x_ref, mean_ref, invstd_ref, out_ref):
    # f32 math is mandatory on v5e (no bf16 VPU) and cheap elsewhere.
    # TODO(synk): a bf16-native path on v6e/v7x would halve vreg pressure.
    x = x_ref[...].astype(jnp.float32)                    # (TN, C, T)
    mean = mean_ref[...]                                  # (C, 1)
    inv_std = invstd_ref[...]                             # (C, 1)
    out_ref[...] = ((x - mean[None]) * inv_std[None]).astype(out_ref.dtype)


# --------------------------------------------------------------------------
# Fused single-pass kernel (whole activation resident in VMEM).
# --------------------------------------------------------------------------
def _fused_kernel(x_ref, out_ref, mean_ref, var_ref, *, epsilon, inv_count):
    x = x_ref[...].astype(jnp.float32)                    # (N, C, HW)
    s = jnp.sum(jnp.sum(x, axis=2, keepdims=True), axis=0)        # (C, 1)
    ss = jnp.sum(jnp.sum(x * x, axis=2, keepdims=True), axis=0)   # (C, 1)
    mean = s * inv_count
    var = jnp.maximum(ss * inv_count - mean * mean, 0.0)
    inv_std = lax.rsqrt(var + epsilon)                    # EUP rsqrt
    mean_ref[...] = mean
    var_ref[...] = var
    out_ref[...] = ((x - mean[None]) * inv_std[None]).astype(out_ref.dtype)


# --------------------------------------------------------------------------
# Wrapper
# --------------------------------------------------------------------------
def batchnorm2d_forward(x_nchw, running_mean, running_var,
                        gamma=None, beta=None,
                        epsilon=1e-5, momentum=0.9, rescale=True,
                        training=True, force_tiled=False, tile_override=None):
    """Forward of BatchNormm2D. Returns (out, new_running_mean, new_running_var).

    gamma/beta are accepted for parity with __init__ but — exactly like the
    reference forward() — they are never applied to the output.
    """
    N, C, H, W = x_nchw.shape
    assert C == running_mean.shape[0]
    HW = H * W
    dtype = x_nchw.dtype
    itemsize = jnp.dtype(dtype).itemsize
    x3 = x_nchw.reshape(N, C, HW)            # free view of contiguous NCHW

    budget = _vmem_budget_bytes()
    target_bytes = min(4 << 20, budget // 12)
    if tile_override is not None:
        TN, T = tile_override
    else:
        TN, T = _choose_tiles(N, C, HW, itemsize, target_bytes)
    grid = (pl.cdiv(N, TN), pl.cdiv(HW, T))

    x_spec = pl.BlockSpec((TN, C, T), lambda n, j: (n, 0, j))
    stat_spec = pl.BlockSpec((C, 1), lambda n, j: (0, 0))

    rm = running_mean.astype(jnp.float32)
    rv = running_var.astype(jnp.float32)

    def _run_normalize(mean_c1, invstd_c1):
        return pl.pallas_call(
            _normalize_kernel,
            out_shape=jax.ShapeDtypeStruct((N, C, HW), dtype),
            grid=grid,
            in_specs=[x_spec, stat_spec, stat_spec],
            out_specs=pl.BlockSpec((TN, C, T), lambda n, j: (n, 0, j)),
            compiler_params=pltpu.CompilerParams(
                dimension_semantics=("parallel", "parallel"),
                vmem_limit_bytes=budget),
        )(x3, mean_c1, invstd_c1)

    # ---------------- eval mode ----------------
    if not training:
        m = float(N * HW)
        inv_std = lax.rsqrt(m / (m - 1.0) * rv + epsilon)
        out3 = _run_normalize(rm.reshape(C, 1), inv_std.reshape(C, 1))
        return out3.reshape(N, C, H, W), running_mean, running_var

    # ---------------- training mode ----------------
    x_bytes = N * C * HW * itemsize
    fused_resident = 2 * x_bytes + 2 * N * C * HW * 4   # in + out + f32 temps
    use_fused = (not force_tiled) and (fused_resident <= budget // 2)

    inv_count = 1.0 / float(N * HW)

    if use_fused:
        fused = functools.partial(_fused_kernel,
                                  epsilon=float(epsilon), inv_count=inv_count)
        out3, mean_c1, var_c1 = pl.pallas_call(
            fused,
            out_shape=(jax.ShapeDtypeStruct((N, C, HW), dtype),
                       jax.ShapeDtypeStruct((C, 1), jnp.float32),
                       jax.ShapeDtypeStruct((C, 1), jnp.float32)),
            compiler_params=pltpu.CompilerParams(vmem_limit_bytes=budget),
        )(x3)
        mean = mean_c1[:, 0]
        var = var_c1[:, 0]
    else:
        GN = grid[0]
        stats = functools.partial(
            _stats_kernel, tn=TN, t=T, n_total=N, hw=HW,
            mask_n=(N % TN != 0), mask_hw=(HW % T != 0))
        psum, psumsq = pl.pallas_call(
            stats,
            out_shape=(jax.ShapeDtypeStruct((GN, C, 1), jnp.float32),
                       jax.ShapeDtypeStruct((GN, C, 1), jnp.float32)),
            grid=grid,
            in_specs=[x_spec],
            out_specs=(pl.BlockSpec((1, C, 1), lambda n, j: (n, 0, 0)),
                       pl.BlockSpec((1, C, 1), lambda n, j: (n, 0, 0))),
            scratch_shapes=[pltpu.VMEM((C, T), jnp.float32),
                            pltpu.VMEM((C, T), jnp.float32)],
            compiler_params=pltpu.CompilerParams(
                dimension_semantics=("parallel", "arbitrary"),
                vmem_limit_bytes=budget),
        )(x3)
        # Tiny O(C) combine in plain JAX (also enables the per-N-tile
        # parallelism above without any cross-core race).
        # TODO(synk): a shifted/Welford combine would improve f32 accuracy for
        # very large N*H*W per channel.
        mean = jnp.sum(psum[:, :, 0], axis=0) * inv_count
        ex2 = jnp.sum(psumsq[:, :, 0], axis=0) * inv_count
        var = jnp.maximum(ex2 - mean * mean, 0.0)
        inv_std = lax.rsqrt(var + epsilon)
        out3 = _run_normalize(mean.reshape(C, 1), inv_std.reshape(C, 1))

    new_rm = (1.0 - momentum) * mean + momentum * rm
    new_rv = (1.0 - momentum) * var + momentum * rv
    return out3.reshape(N, C, H, W), new_rm, new_rv


# --------------------------------------------------------------------------
# References + test
# --------------------------------------------------------------------------
def _reference_train(x, rm, rv, epsilon=1e-5, momentum=0.9):
    mean = jnp.mean(x, axis=(0, 2, 3))
    var = jnp.var(x, axis=(0, 2, 3))  # biased (unbiased=False)
    out = (x - mean.reshape(1, -1, 1, 1)) / jnp.sqrt(
        var.reshape(1, -1, 1, 1) + epsilon)
    new_rm = (1 - momentum) * mean + momentum * rm
    new_rv = (1 - momentum) * var + momentum * rv
    return out, new_rm, new_rv


def _reference_eval(x, rm, rv, epsilon=1e-5):
    m = x.shape[0] * x.shape[2] * x.shape[3]
    return (x - rm.reshape(1, -1, 1, 1)) / jnp.sqrt(
        m / (m - 1) * rv.reshape(1, -1, 1, 1) + epsilon)


if __name__ == "__main__":
    key = jax.random.PRNGKey(0)
    k1, k2 = jax.random.split(key)

    # ---- Test 1: small shape (fused single-pass path) --------------------
    N, C, H, W = 2, 4, 16, 16
    x = jax.random.normal(k1, (N, C, H, W), dtype=jnp.float32)
    gamma = jnp.ones((C,), jnp.float32)   # unused by forward (as in reference)
    beta = jnp.zeros((C,), jnp.float32)   # unused by forward (as in reference)
    rm0 = jnp.zeros((C,), jnp.float32)
    rv0 = jnp.ones((C,), jnp.float32)

    out, nrm, nrv = batchnorm2d_forward(x, rm0, rv0, gamma, beta,
                                        epsilon=1e-5, momentum=0.9)
    jax.block_until_ready(out)
    ref_out, ref_rm, ref_rv = _reference_train(x, rm0, rv0)
    assert out.shape == (N, C, H, W)
    assert jnp.max(jnp.abs(out - ref_out)) < 2e-4
    assert jnp.max(jnp.abs(nrm - ref_rm)) < 2e-5
    assert jnp.max(jnp.abs(nrv - ref_rv)) < 2e-5

    # ---- Test 2: same input through the tiled two-pass path --------------
    out2, nrm2, nrv2 = batchnorm2d_forward(x, rm0, rv0, gamma, beta,
                                           epsilon=1e-5, momentum=0.9,
                                           force_tiled=True)
    jax.block_until_ready(out2)
    assert jnp.max(jnp.abs(out2 - ref_out)) < 2e-4
    assert jnp.max(jnp.abs(nrm2 - ref_rm)) < 2e-5
    assert jnp.max(jnp.abs(nrv2 - ref_rv)) < 2e-5

    # ---- Test 3: ragged tiles (exercises edge masking in the stats pass) -
    N3, C3, H3, W3 = 3, 8, 20, 20
    x3 = jax.random.normal(k2, (N3, C3, H3, W3), dtype=jnp.float32)
    rm3 = jnp.zeros((C3,), jnp.float32)
    rv3 = jnp.ones((C3,), jnp.float32)
    out3, nrm3, nrv3 = batchnorm2d_forward(x3, rm3, rv3,
                                           epsilon=1e-5, momentum=0.9,
                                           force_tiled=True,
                                           tile_override=(2, 128))
    jax.block_until_ready(out3)
    ref3_out, ref3_rm, ref3_rv = _reference_train(x3, rm3, rv3)
    assert jnp.max(jnp.abs(out3 - ref3_out)) < 2e-4
    assert jnp.max(jnp.abs(nrm3 - ref3_rm)) < 2e-5
    assert jnp.max(jnp.abs(nrv3 - ref3_rv)) < 2e-5

    # ---- Test 4: eval mode ------------------------------------------------
    rm_e = 0.1 * jnp.arange(C, dtype=jnp.float32)
    rv_e = 1.0 + 0.05 * jnp.arange(C, dtype=jnp.float32)
    out_e, rme, rve = batchnorm2d_forward(x, rm_e, rv_e, training=False)
    jax.block_until_ready(out_e)
    ref_e = _reference_eval(x, rm_e, rv_e)
    assert jnp.max(jnp.abs(out_e - ref_e)) < 2e-4
    assert jnp.max(jnp.abs(rme - rm_e)) == 0.0
    assert jnp.max(jnp.abs(rve - rv_e)) == 0.0

    print("KERNEL_OK")
</pallas_src>

<mosaic_0001>
module attributes {stable_mosaic.version = 11 : i64} {
  func.func @_fused_kernel(%arg0: memref<2x4x256xf32, #tpu.memory_space<vmem>>, %arg1: memref<2x4x256xf32, #tpu.memory_space<vmem>>, %arg2: memref<4x1xf32, #tpu.memory_space<vmem>>, %arg3: memref<4x1xf32, #tpu.memory_space<vmem>>) attributes {dimension_semantics = [], scalar_prefetch = 0 : i64, scratch_operands = 0 : i64, tpu.core_type = #tpu.core_type<tc>} {
    %c0 = arith.constant 0 : index
    %c0_0 = arith.constant 0 : index
    %c0_1 = arith.constant 0 : index
    %0 = vector.load %arg0[%c0, %c0_0, %c0_1] : memref<2x4x256xf32, #tpu.memory_space<vmem>>, vector<2x4x256xf32>
    %cst = arith.constant dense<0.000000e+00> : vector<2x4xf32>
    %1 = vector.multi_reduction <add>, %0, %cst [2] : vector<2x4x256xf32> to vector<2x4xf32>
    %2 = vector.shape_cast %1 : vector<2x4xf32> to vector<2x4x1xf32>
    %cst_2 = arith.constant dense<0.000000e+00> : vector<4x1xf32>
    %3 = vector.multi_reduction <add>, %2, %cst_2 [0] : vector<2x4x1xf32> to vector<4x1xf32>
    %4 = arith.mulf %0, %0 : vector<2x4x256xf32>
    %cst_3 = arith.constant dense<0.000000e+00> : vector<2x4xf32>
    %5 = vector.multi_reduction <add>, %4, %cst_3 [2] : vector<2x4x256xf32> to vector<2x4xf32>
    %6 = vector.shape_cast %5 : vector<2x4xf32> to vector<2x4x1xf32>
    %cst_4 = arith.constant dense<0.000000e+00> : vector<4x1xf32>
    %7 = vector.multi_reduction <add>, %6, %cst_4 [0] : vector<2x4x1xf32> to vector<4x1xf32>
    %cst_5 = arith.constant 0.001953125 : f32
    %8 = vector.broadcast %cst_5 : f32 to vector<4x1xf32>
    %9 = arith.mulf %3, %8 : vector<4x1xf32>
    %cst_6 = arith.constant 0.001953125 : f32
    %10 = vector.broadcast %cst_6 : f32 to vector<4x1xf32>
    %11 = arith.mulf %7, %10 : vector<4x1xf32>
    %12 = arith.mulf %9, %9 : vector<4x1xf32>
    %13 = arith.subf %11, %12 : vector<4x1xf32>
    %cst_7 = arith.constant 0.000000e+00 : f32
    %14 = vector.broadcast %cst_7 : f32 to vector<4x1xf32>
    %15 = arith.maximumf %13, %14 : vector<4x1xf32>
    %cst_8 = arith.constant 9.99999974E-6 : f32
    %16 = vector.broadcast %cst_8 : f32 to vector<4x1xf32>
    %17 = arith.addf %15, %16 : vector<4x1xf32>
    %18 = math.rsqrt %17 : vector<4x1xf32>
    %c0_9 = arith.constant 0 : index
    %c0_10 = arith.constant 0 : index
    %19 = vector.load %arg2[%c0_9, %c0_10] : memref<4x1xf32, #tpu.memory_space<vmem>>, vector<4x1xf32>
    tpu.vector_store %arg2[%c0_9, %c0_10], %9 {strides = array<i32>} : memref<4x1xf32, #tpu.memory_space<vmem>>, vector<4x1xf32>,
    %c0_11 = arith.constant 0 : index
    %c0_12 = arith.constant 0 : index
    %20 = vector.load %arg3[%c0_11, %c0_12] : memref<4x1xf32, #tpu.memory_space<vmem>>, vector<4x1xf32>
    tpu.vector_store %arg3[%c0_11, %c0_12], %15 {strides = array<i32>} : memref<4x1xf32, #tpu.memory_space<vmem>>, vector<4x1xf32>,
    %21 = vector.shape_cast %9 : vector<4x1xf32> to vector<1x4x1xf32>
    %22 = vector.broadcast %21 : vector<1x4x1xf32> to vector<2x4x256xf32>
    %23 = arith.subf %0, %22 : vector<2x4x256xf32>
    %24 = vector.shape_cast %18 : vector<4x1xf32> to vector<1x4x1xf32>
    %25 = vector.broadcast %24 : vector<1x4x1xf32> to vector<2x4x256xf32>
    %26 = arith.mulf %23, %25 : vector<2x4x256xf32>
    %c0_13 = arith.constant 0 : index
    %c0_14 = arith.constant 0 : index
    %c0_15 = arith.constant 0 : index
    %27 = vector.load %arg1[%c0_13, %c0_14, %c0_15] : memref<2x4x256xf32, #tpu.memory_space<vmem>>, vector<2x4x256xf32>
    tpu.vector_store %arg1[%c0_13, %c0_14, %c0_15], %26 {strides = array<i32>} : memref<2x4x256xf32, #tpu.memory_space<vmem>>, vector<2x4x256xf32>,
    return
  }
}

</mosaic_0001>

<bundles_post_ra>
// kernel: tpu_custom_call.1
= control target key start
LH: loop header
LB: loop body
LE: loop exit
PB: predicated region body
PF: predicated region fallthrough
CT: control target
= control target key end

     0   :  { %9 = vsyncpa [#allocation3], 0  ;;  %s258_s0 = inlined_call_operand.hbm [shape: f32[2,4,256], index: 0, kind: input, shape index: {}]   ;;  %s259_s1 = inlined_call_operand.hbm [shape: f32[2,4,256], index: 1, kind: output, shape index: {0}]   ;;  %s260_s2 = inlined_call_operand.vmem [shape: f32[4,1], index: 2, kind: output, shape index: {1}]   ;;  %s261_s3 = inlined_call_operand.vmem [shape: f32[4,1], index: 3, kind: output, shape index: {2}]  }
   0x1   :  { %10 = vsyncpa [#allocation4], 0  ;;  %s185_s12 = smov [#allocation2]   ;;  %s137_s16 = scalar_lea.hbm %s258_s0, 256 }
   0x2   :  { %s16_s13 = sshll.u32 %s185_s12, 4  ;;  %p138_p0 = scmp.ne.s32.totalorder %s258_s0, %s137_s16  ;;  %s17_s13 = int_to_ptr.vmem [resolvable:$true] %s16_s13 }
   0x3   :  { %p141_p1 = scmp.lt.u32.totalorder %s137_s16, %s258_s0 }
   0x5   :  { %p143_p2 = pnand %p141_p1, %p138_p0 }
   0x7   :  { %146 = shalt.err (!%p143_p2)
}
   0x8   :  { %s147_s21 = scalar_lea.vmem %s17_s13, 256  ;;  %p152_p4 = scmp.lt.s32.totalorder %s17_s13, %s17_s13 }
   0x9   :  { %p148_p3 = scmp.ne.s32.totalorder %s17_s13, %s147_s21  ;;  %p153_p5 = scmp.lt.s32.totalorder %s147_s21, %s147_s21 }
   0xb   :  { %p154_p6 = por %p153_p5, %p152_p4 }
   0xd   :  { %p155_p7 = pnand %p154_p6, %p148_p3 }
   0xf   :  { %158 = shalt.err (!%p155_p7)
}
  0x10   :  { %s186_s22 = smov 128   ;;  %s187_s23 = smov 8  }
  0x11   :  { %22 = dma.hbm_to_vmem [thread:$0]  %s258_s0, 256, %s17_s13, [#allocation3], %s186_s22, %s186_s22, %s187_s23  }
  0x12   :  { %181 = dma.done.wait [#allocation3], 256  }
  0x13   :  { %182 = vsyncadd [#allocation3], 4294967040  ;;  %vm34_vm0 = vcmask 1043456   ;;  %v26_v0 = vld [vmem:[#allocation2] sm:$0xff]  ;;  %v27_v1 = vld [vmem:[#allocation2 + $0x8] sm:$0xff]  ;;  %vm76_vm1 = vcmask 3072   ;;  %v83_v36 = vlaneseq }
  0x14   :  { %v30_v2 = vcombine.high %v26_v0, %v26_v0  ;;  %v35_v3 = vsel %vm34_vm0, %v26_v0, 0.0  ;;  %v48_v4 = vmul.f32 %v26_v0, %v26_v0  ;;  %v31_v5 = vcombine.high %v27_v1, %v27_v1  ;;  %s189_s29 = smov [#allocation5]  }
  0x15   :  { %v40_v6 = vsel %vm34_vm0, %v27_v1, 0.0  ;;  %v49_v7 = vmul.f32 %v27_v1, %v27_v1  ;;  %v188_v34 = vmov 839922192   ;;  %v84_v40 = vshrl.u32 %v83_v36, 7 }
  0x16   :  { %v36_v8 = vsel %vm34_vm0, %v30_v2, 0.0  ;;  %v52_v9 = vcombine.high %v48_v4, %v48_v4  ;;  %v56_v10 = vsel %vm34_vm0, %v48_v4, 0.0  ;;  %v41_v11 = vsel %vm34_vm0, %v31_v5, 0.0 }
  0x17   :  { %v37_v12 = vadd.f32 %v36_v8, %v35_v3  ;;  %v53_v13 = vcombine.high %v49_v7, %v49_v7  ;;  %v61_v15 = vsel %vm34_vm0, %v49_v7, 0.0  ;;  %v42_v17 = vadd.f32 %v41_v11, %v40_v6 }
  0x18   :  { %v57_v14 = vsel %vm34_vm0, %v52_v9, 0.0  ;;  %v81_v35 = vunpack.c.l.s4 %v188_v34 }
  0x19   :  { %38 = vadd.xlane.f32.xlu0 %v37_v12  ;;  %v58_v16 = vadd.f32 %v57_v14, %v56_v10  ;;  %v62_v18 = vsel %vm34_vm0, %v53_v13, 0.0 }
  0x1a   :  { %v63_v19 = vadd.f32 %v62_v18, %v61_v15  ;;  %v82_v39 = vunpack.c.0.s8 %v81_v35 }
  0x1b   :  { %59 = vadd.xlane.f32.xlu1 %v58_v16 }
  0x1c   :  { %v85_v41 = vsub.s32 %v82_v39, %v84_v40 }
  0x1d   :  { %43 = vadd.xlane.f32.xlu0 %v42_v17 }
  0x1f   :  { %64 = vadd.xlane.f32.xlu1 %v63_v19 }
  0xa6   :  { %v39_v20 = vpop.xlane.xlu0 %38 }
  0xa7   :  { %v45_v23 = vsel %vm34_vm0, %v39_v20, 0.0 }
  0xa8   :  { %v60_v21 = vpop.xlane.xlu1 %59 }
  0xa9   :  { %v66_v27 = vsel %vm34_vm0, %v60_v21, 0.0 }
  0xaa   :  { %v44_v22 = vpop.xlane.xlu0 %43 }
  0xab   :  { %v46_v24 = vsel %vm34_vm0, %v44_v22, 0.0 }
  0xac   :  { %v47_v25 = vadd.f32 %v46_v24, %v45_v23  ;;  %v65_v26 = vpop.xlane.xlu1 %64 }
  0xad   :  { %v67_v28 = vsel %vm34_vm0, %v65_v26, 0.0 }
  0xae   :  { %v69_v29 = vmul.f32 0.001953125, %v47_v25  ;;  %v68_v30 = vadd.f32 %v67_v28, %v66_v27 }
  0xb0   :  { %77 = vst.msk [vmem:[%s260_s2] sm:$0xf] %vm76_vm1, %v69_v29  ;;  %v70_v31 = vmul.f32 0.001953125, %v68_v30  ;;  %v71_v32 = vmul.f32 %v69_v29, %v69_v29  ;;  %v86_v42 = vrot.slane %v69_v29, %v85_v41  ;;  %s108_s2 = sshll.u32 %s189_s29, 4  ;;  %s109_s2 = int_to_ptr.vmem [resolvable:$true] %s108_s2 }
  0xb1   :  { %s159_s30 = scalar_lea.vmem %s109_s2, 256  ;;  %p164_p9 = scmp.lt.s32.totalorder %s109_s2, %s109_s2 }
  0xb2   :  { %v72_v33 = vsub.f32 %v70_v31, %v71_v32  ;;  %v88_v44 = vsub.f32 %v26_v0, %v86_v42  ;;  %v89_v45 = vsub.f32 %v27_v1, %v86_v42  ;;  %p160_p8 = scmp.ne.s32.totalorder %s109_s2, %s159_s30  ;;  %p165_p10 = scmp.lt.s32.totalorder %s159_s30, %s159_s30 }
  0xb4   :  { %v73_v37 = vmax.f32 %v72_v33, 0.0  ;;  %p166_p11 = por %p165_p10, %p164_p9 }
  0xb6   :  { %v74_v38 = vadd.f32 1e-05, %v73_v37  ;;  %78 = vst.msk [vmem:[%s261_s3] sm:$0xf] %vm76_vm1, %v73_v37  ;;  %p167_p12 = pnand %p166_p11, %p160_p8 }
  0xb8   :  { %135 = vrsqrt.f32 %v74_v38 }
  0xc2   :  { %v136_v43 = vpop.eup %135 }
  0xc3   :  { %v97_v46 = vrot.slane %v136_v43, %v85_v41 }
  0xc5   :  { %v99_v47 = vmul.f32 %v97_v46, %v88_v44  ;;  %v100_v48 = vmul.f32 %v97_v46, %v89_v45 }
  0xc7   :  { %101 = vst [vmem:[#allocation5] sm:$0xff] %v99_v47  ;;  %102 = vst [vmem:[#allocation5 + $0x8] sm:$0xff] %v100_v48 }
  0xc8   :  { %170 = shalt.err (!%p167_p12)
}
  0xc9   :  { %s171_s5 = scalar_lea.hbm %s259_s1, 256 }
  0xca   :  { %p172_p13 = scmp.ne.s32.totalorder %s259_s1, %s171_s5  ;;  %p175_p0 = scmp.lt.u32.totalorder %s171_s5, %s259_s1 }
  0xcc   :  { %p177_p1 = pnand %p175_p0, %p172_p13 }
  0xce   :  { %180 = shalt.err (!%p177_p1)
}
  0xcf   :  { %114 = dma.vmem_to_hbm [thread:$0]  %s109_s2, 256, %s259_s1, [#allocation4], %s186_s22, %s186_s22, %s187_s23  }
  0xd0   :  { %183 = dma.done.wait [#allocation4], 256  }
  0xd1   :  { %184 = vsyncadd [#allocation4], 4294967040 }
  0xd2   :  { %126 = vsyncpa [#allocation3], 1 }
  0xd3   :  { %127 = vsyncpa [#allocation4], 1 }

</bundles_post_ra>
